<compile_context>
chip_gen: v5e
topology: v5e:2x2
jax: 0.10.0
libtpu: 0.0.40
codegen_flags: <defaults>
</compile_context>

<pallas_src>
import math
import functools

import numpy as np
import jax
import jax.numpy as jnp
from jax import lax
from jax.experimental import pallas as pl
from jax.experimental.pallas import tpu as pltpu


def _round_up(a, b):
    return (a + b - 1) // b * b


def transformer_layer_kernel(x_ref, wqkv_ref, wlt_ref, bl_ref,
                             step_ref, attn_ref, *,
                             scale, seq_len, block_q, d_pad):
    """One query block per grid step.  All weights + full x are VMEM resident
    (constant block index), outputs are (block_q, d_pad) lane-dense tiles."""
    i = pl.program_id(0)
    qstart = pl.multiple_of(i * block_q, block_q)

    x_all = x_ref[...]                                  # (S_pad, d_model) bf16
    x_q = x_ref[pl.ds(qstart, block_q), :]              # (block_q, d_model) bf16

    # Fused projection weight, lane-aligned static slices (0:d_pad, d_pad:3*d_pad).
    w_q = wqkv_ref[:, :d_pad]                           # (d_model, d_pad)
    w_kv = wqkv_ref[:, d_pad:]                          # (d_model, 2*d_pad)

    # Projections: bf16 MXU, f32 accumulation.  K and V in one wide matmul.
    q = jnp.dot(x_q, w_q, preferred_element_type=jnp.float32)      # (block_q, d_pad)
    kv = jnp.dot(x_all, w_kv, preferred_element_type=jnp.float32)  # (S_pad, 2*d_pad)
    k = kv[:, :d_pad]
    v = kv[:, d_pad:]

    # Scores: contract the last axes of Q and K directly (no .T / relayout).
    scores = lax.dot_general(
        q.astype(jnp.bfloat16), k.astype(jnp.bfloat16),
        (((1,), (1,)), ((), ())),
        preferred_element_type=jnp.float32)             # (block_q, S_pad) f32
    scores = scores * scale

    # Mask out padded key rows (only emitted if S was padded).
    s_pad_keys = scores.shape[1]
    if seq_len < s_pad_keys:
        kidx = lax.broadcasted_iota(jnp.int32, scores.shape, 1)
        scores = jnp.where(kidx < seq_len, scores, -1e30)

    # Numerically-stable softmax, all in f32.
    scores = scores - jnp.max(scores, axis=-1, keepdims=True)
    p = jnp.exp(scores)
    p = p * pl.reciprocal(jnp.sum(p, axis=-1, keepdims=True), approx=True)

    # TODO(synk): for very large S, tile K/V with an online-softmax (flash-style)
    # inner loop instead of materializing the (block_q, S) scores buffer.
    attn = jnp.dot(p.astype(jnp.bfloat16), v.astype(jnp.bfloat16),
                   preferred_element_type=jnp.float32)  # (block_q, d_pad) f32

    relu = jnp.maximum(attn, 0.0)
    step = jnp.dot(relu.astype(jnp.bfloat16), wlt_ref[...],
                   preferred_element_type=jnp.float32) + bl_ref[...]

    attn_ref[...] = attn
    step_ref[...] = step


def transformer_layer(x, wq, wk, wv, wl, bl, *, d_model=None, block_q=256):
    """x: (S, d_model); wq/wk/wv: (d_model, d_internal) (PyTorch nn.Linear weight
    storage, used as x @ W); wl: (d_internal, d_internal); bl: (d_internal,).
    Returns (step, attention), both (S, d_internal) float32."""
    S, dm = x.shape
    if d_model is None:
        d_model = dm
    d_internal = wq.shape[1]

    # Lane-pad the internal dim to a multiple of 128 (full-lane loads/stores).
    d_pad = _round_up(max(d_internal, 128), 128)

    def pad_cols(w):
        return jnp.pad(w, ((0, 0), (0, d_pad - w.shape[1])))

    # One fused QKV weight -> single weight DMA inside the kernel.
    wqkv = jnp.concatenate([pad_cols(wq), pad_cols(wk), pad_cols(wv)], axis=1)
    # Output Linear: pre-transpose once here so the kernel does relu @ wlt (+ b).
    wlt = jnp.pad(wl.T, ((0, d_pad - d_internal), (0, d_pad - d_internal)))
    blp = jnp.pad(jnp.reshape(bl, (1, -1)).astype(jnp.float32),
                  ((0, 0), (0, d_pad - d_internal)))

    # Query-block tiling; pad the sequence so it divides evenly.
    block_q = max(8, min(block_q, _round_up(S, 8)))
    block_q = _round_up(block_q, 8)
    s_pad = _round_up(S, block_q)
    xp = jnp.pad(x, ((0, s_pad - S), (0, 0)))

    # bf16 MXU inputs (f32 accumulation in-kernel).
    xp = xp.astype(jnp.bfloat16)
    wqkv = wqkv.astype(jnp.bfloat16)
    wlt = wlt.astype(jnp.bfloat16)

    grid = (s_pad // block_q,)
    kernel = functools.partial(
        transformer_layer_kernel,
        scale=1.0 / math.sqrt(d_model),
        seq_len=S, block_q=block_q, d_pad=d_pad)

    step, attn = pl.pallas_call(
        kernel,
        out_shape=(jax.ShapeDtypeStruct((s_pad, d_pad), jnp.float32),
                   jax.ShapeDtypeStruct((s_pad, d_pad), jnp.float32)),
        grid=grid,
        in_specs=[
            pl.BlockSpec((s_pad, dm), lambda i: (0, 0)),        # x (resident)
            pl.BlockSpec((dm, 3 * d_pad), lambda i: (0, 0)),    # fused Wqkv
            pl.BlockSpec((d_pad, d_pad), lambda i: (0, 0)),     # Wl^T (padded)
            pl.BlockSpec((1, d_pad), lambda i: (0, 0)),         # bias (padded)
        ],
        out_specs=(
            pl.BlockSpec((block_q, d_pad), lambda i: (i, 0)),   # step tile
            pl.BlockSpec((block_q, d_pad), lambda i: (i, 0)),   # attention tile
        ),
        compiler_params=pltpu.CompilerParams(
            dimension_semantics=("parallel",)),
    )(xp, wqkv, wlt, blp)

    # Strip the sequence / lane padding.
    return step[:S, :d_internal], attn[:S, :d_internal]


def transformer_layer_ref(x, wq, wk, wv, wl, bl, *, d_model=None):
    """Pure-JAX f32 reference matching the PyTorch module semantics."""
    if d_model is None:
        d_model = x.shape[1]
    q = x @ wq
    k = x @ wk
    v = x @ wv
    scores = (q @ k.T) / math.sqrt(d_model)
    p = jax.nn.softmax(scores, axis=-1)
    attn = p @ v
    step = jnp.maximum(attn, 0.0) @ wl.T + jnp.reshape(bl, (1, -1))
    return step, attn


if __name__ == "__main__":
    # Small shapes consistent with the module; S is NOT a multiple of block_q
    # so both the sequence padding/masking path and the multi-block grid run.
    S, d_model, d_internal = 100, 32, 16

    key = jax.random.PRNGKey(0)
    kx, kq, kk, kv_, kl, kb = jax.random.split(key, 6)

    x = jax.random.normal(kx, (S, d_model), dtype=jnp.float32)

    def linear_weight(k, out_f, in_f):
        bound = 1.0 / math.sqrt(in_f)
        return jax.random.uniform(k, (out_f, in_f), jnp.float32, -bound, bound)

    # nn.Linear(d_internal, d_model).weight  -> (d_model, d_internal)
    wq = linear_weight(kq, d_model, d_internal)
    wk = linear_weight(kk, d_model, d_internal)
    wv = linear_weight(kv_, d_model, d_internal)
    # nn.Linear(d_internal, d_internal)
    wl = linear_weight(kl, d_internal, d_internal)
    bl = jax.random.uniform(kb, (d_internal,), jnp.float32,
                            -1.0 / math.sqrt(d_internal),
                            1.0 / math.sqrt(d_internal))

    step, attn = transformer_layer(x, wq, wk, wv, wl, bl,
                                   d_model=d_model, block_q=64)
    jax.block_until_ready((step, attn))

    step_ref, attn_ref = transformer_layer_ref(x, wq, wk, wv, wl, bl,
                                               d_model=d_model)
    # bf16 matmul inputs -> loosened tolerance vs. the f32 reference.
    assert np.allclose(np.asarray(attn), np.asarray(attn_ref),
                       rtol=2e-2, atol=2e-2), "attention mismatch"
    assert np.allclose(np.asarray(step), np.asarray(step_ref),
                       rtol=2e-2, atol=2e-2), "step mismatch"

    print("KERNEL_OK")
</pallas_src>

<mosaic_0001>
module attributes {stable_mosaic.version = 11 : i64} {
  func.func @transformer_layer_kernel(%arg0: i32, %arg1: memref<128x32xbf16, #tpu.memory_space<vmem>>, %arg2: memref<32x384xbf16, #tpu.memory_space<vmem>>, %arg3: memref<128x128xbf16, #tpu.memory_space<vmem>>, %arg4: memref<1x128xf32, #tpu.memory_space<vmem>>, %arg5: memref<64x128xf32, #tpu.memory_space<vmem>>, %arg6: memref<64x128xf32, #tpu.memory_space<vmem>>) attributes {dimension_semantics = [#tpu.dimension_semantics<parallel>], iteration_bounds = array<i64: 2>, scalar_prefetch = 0 : i64, scratch_operands = 0 : i64, tpu.core_type = #tpu.core_type<tc>, window_params = [{pipeline_mode = #tpu.pipeline_mode<synchronous>, transform_indices = @transform_0, window_bounds = array<i64: 128, 32>}, {pipeline_mode = #tpu.pipeline_mode<synchronous>, transform_indices = @transform_1, window_bounds = array<i64: 32, 384>}, {pipeline_mode = #tpu.pipeline_mode<synchronous>, transform_indices = @transform_2, window_bounds = array<i64: 128, 128>}, {pipeline_mode = #tpu.pipeline_mode<synchronous>, transform_indices = @transform_3, window_bounds = array<i64: 1, 128>}, {transform_indices = @transform_4, window_bounds = array<i64: 64, 128>}, {transform_indices = @transform_5, window_bounds = array<i64: 64, 128>}]} {
    %c64_i32 = arith.constant 64 : i32
    %0 = arith.muli %arg0, %c64_i32 : i32
    %1 = tpu.assume_multiple %0, 64 : i32
    %c0 = arith.constant 0 : index
    %c0_0 = arith.constant 0 : index
    %2 = vector.load %arg1[%c0, %c0_0] : memref<128x32xbf16, #tpu.memory_space<vmem>>, vector<128x32xbf16>
    %3 = arith.index_cast %1 : i32 to index
    %c0_1 = arith.constant 0 : index
    %4 = vector.load %arg1[%3, %c0_1] : memref<128x32xbf16, #tpu.memory_space<vmem>>, vector<64x32xbf16>
    %c0_2 = arith.constant 0 : index
    %c0_3 = arith.constant 0 : index
    %5 = vector.load %arg2[%c0_2, %c0_3] : memref<32x384xbf16, #tpu.memory_space<vmem>>, vector<32x128xbf16>
    %c0_4 = arith.constant 0 : index
    %c128 = arith.constant 128 : index
    %6 = vector.load %arg2[%c0_4, %c128] : memref<32x384xbf16, #tpu.memory_space<vmem>>, vector<32x256xbf16>
    %cst = arith.constant dense<0.000000e+00> : vector<64x128xf32>
    %7 = tpu.matmul %4, %5, %cst {dimension_numbers = #tpu.dot_dimension_numbers<[1], [0], [0], [1], [0, 0, 1, 1], [], []>} : vector<64x32xbf16>, vector<32x128xbf16>, vector<64x128xf32> -> vector<64x128xf32>
    %cst_5 = arith.constant dense<0.000000e+00> : vector<128x256xf32>
    %8 = tpu.matmul %2, %6, %cst_5 {dimension_numbers = #tpu.dot_dimension_numbers<[1], [0], [0], [1], [0, 0, 1, 1], [], []>} : vector<128x32xbf16>, vector<32x256xbf16>, vector<128x256xf32> -> vector<128x256xf32>
    %9 = vector.extract_strided_slice %8 {offsets = [0, 0], sizes = [128, 128], strides = [1, 1]} : vector<128x256xf32> to vector<128x128xf32>
    %10 = vector.extract_strided_slice %8 {offsets = [0, 128], sizes = [128, 128], strides = [1, 1]} : vector<128x256xf32> to vector<128x128xf32>
    %11 = arith.truncf %7 : vector<64x128xf32> to vector<64x128xbf16>
    %12 = arith.truncf %9 : vector<128x128xf32> to vector<128x128xbf16>
    %cst_6 = arith.constant dense<0.000000e+00> : vector<64x128xf32>
    %13 = tpu.matmul %11, %12, %cst_6 {dimension_numbers = #tpu.dot_dimension_numbers<[1], [1], [0], [0], [0, 0, 1, 0], [], []>} : vector<64x128xbf16>, vector<128x128xbf16>, vector<64x128xf32> -> vector<64x128xf32>
    %cst_7 = arith.constant 0.176776692 : f32
    %14 = vector.broadcast %cst_7 : f32 to vector<64x128xf32>
    %15 = arith.mulf %13, %14 : vector<64x128xf32>
    %16 = tpu.iota {dimensions = array<i32: 1>} : vector<64x128xi32>
    %c100_i32 = arith.constant 100 : i32
    %17 = vector.broadcast %c100_i32 : i32 to vector<64x128xi32>
    %18 = arith.cmpi slt, %16, %17 : vector<64x128xi32>
    %cst_8 = arith.constant -1.000000e+30 : f32
    %19 = vector.broadcast %cst_8 : f32 to vector<64x128xf32>
    %20 = arith.select %18, %15, %19 : vector<64x128xi1>, vector<64x128xf32>
    %cst_9 = arith.constant dense<0xFF800000> : vector<64xf32>
    %21 = vector.multi_reduction <maximumf>, %20, %cst_9 [1] : vector<64x128xf32> to vector<64xf32>
    %22 = vector.shape_cast %21 : vector<64xf32> to vector<64x1xf32>
    %23 = vector.broadcast %22 : vector<64x1xf32> to vector<64x128xf32>
    %24 = arith.subf %20, %23 : vector<64x128xf32>
    %25 = math.exp %24 : vector<64x128xf32>
    %cst_10 = arith.constant dense<0.000000e+00> : vector<64xf32>
    %26 = vector.multi_reduction <add>, %25, %cst_10 [1] : vector<64x128xf32> to vector<64xf32>
    %27 = vector.shape_cast %26 : vector<64xf32> to vector<64x1xf32>
    %28 = tpu.reciprocal %27 {approx = true} : vector<64x1xf32> -> vector<64x1xf32>
    %29 = vector.broadcast %28 : vector<64x1xf32> to vector<64x128xf32>
    %30 = arith.mulf %25, %29 : vector<64x128xf32>
    %31 = arith.truncf %30 : vector<64x128xf32> to vector<64x128xbf16>
    %32 = arith.truncf %10 : vector<128x128xf32> to vector<128x128xbf16>
    %cst_11 = arith.constant dense<0.000000e+00> : vector<64x128xf32>
    %33 = tpu.matmul %31, %32, %cst_11 {dimension_numbers = #tpu.dot_dimension_numbers<[1], [0], [0], [1], [0, 0, 1, 1], [], []>} : vector<64x128xbf16>, vector<128x128xbf16>, vector<64x128xf32> -> vector<64x128xf32>
    %cst_12 = arith.constant 0.000000e+00 : f32
    %34 = vector.broadcast %cst_12 : f32 to vector<64x128xf32>
    %35 = arith.maximumf %33, %34 : vector<64x128xf32>
    %36 = arith.truncf %35 : vector<64x128xf32> to vector<64x128xbf16>
    %c0_13 = arith.constant 0 : index
    %c0_14 = arith.constant 0 : index
    %37 = vector.load %arg3[%c0_13, %c0_14] : memref<128x128xbf16, #tpu.memory_space<vmem>>, vector<128x128xbf16>
    %cst_15 = arith.constant dense<0.000000e+00> : vector<64x128xf32>
    %38 = tpu.matmul %36, %37, %cst_15 {dimension_numbers = #tpu.dot_dimension_numbers<[1], [0], [0], [1], [0, 0, 1, 1], [], []>} : vector<64x128xbf16>, vector<128x128xbf16>, vector<64x128xf32> -> vector<64x128xf32>
    %c0_16 = arith.constant 0 : index
    %c0_17 = arith.constant 0 : index
    %39 = vector.load %arg4[%c0_16, %c0_17] : memref<1x128xf32, #tpu.memory_space<vmem>>, vector<1x128xf32>
    %40 = vector.broadcast %39 : vector<1x128xf32> to vector<64x128xf32>
    %41 = arith.addf %38, %40 : vector<64x128xf32>
    %c0_18 = arith.constant 0 : index
    %c0_19 = arith.constant 0 : index
    %42 = vector.load %arg6[%c0_18, %c0_19] : memref<64x128xf32, #tpu.memory_space<vmem>>, vector<64x128xf32>
    tpu.vector_store %arg6[%c0_18, %c0_19], %33 {strides = array<i32>} : memref<64x128xf32, #tpu.memory_space<vmem>>, vector<64x128xf32>,
    %c0_20 = arith.constant 0 : index
    %c0_21 = arith.constant 0 : index
    %43 = vector.load %arg5[%c0_20, %c0_21] : memref<64x128xf32, #tpu.memory_space<vmem>>, vector<64x128xf32>
    tpu.vector_store %arg5[%c0_20, %c0_21], %41 {strides = array<i32>} : memref<64x128xf32, #tpu.memory_space<vmem>>, vector<64x128xf32>,
    return
  }
  func.func @transform_0(%arg0: i32) -> (i32, i32) {
    %c0_i32 = arith.constant 0 : i32
    %c0_i32_0 = arith.constant 0 : i32
    %c0_i32_1 = arith.constant 0 : i32
    return %c0_i32, %c0_i32_0 : i32, i32
  }
  func.func @transform_1(%arg0: i32) -> (i32, i32) {
    %c0_i32 = arith.constant 0 : i32
    %c0_i32_0 = arith.constant 0 : i32
    %c0_i32_1 = arith.constant 0 : i32
    return %c0_i32, %c0_i32_0 : i32, i32
  }
  func.func @transform_2(%arg0: i32) -> (i32, i32) {
    %c0_i32 = arith.constant 0 : i32
    %c0_i32_0 = arith.constant 0 : i32
    %c0_i32_1 = arith.constant 0 : i32
    return %c0_i32, %c0_i32_0 : i32, i32
  }
  func.func @transform_3(%arg0: i32) -> (i32, i32) {
    %c0_i32 = arith.constant 0 : i32
    %c0_i32_0 = arith.constant 0 : i32
    %c0_i32_1 = arith.constant 0 : i32
    return %c0_i32, %c0_i32_0 : i32, i32
  }
  func.func @transform_4(%arg0: i32) -> (i32, i32) {
    %c0_i32 = arith.constant 0 : i32
    %c0_i32_0 = arith.constant 0 : i32
    return %arg0, %c0_i32 : i32, i32
  }
  func.func @transform_5(%arg0: i32) -> (i32, i32) {
    %c0_i32 = arith.constant 0 : i32
    %c0_i32_0 = arith.constant 0 : i32
    return %arg0, %c0_i32 : i32, i32
  }
}

</mosaic_0001>

<bundles_post_ra>
// kernel: tpu_custom_call.1
= control target key start
LH: loop header
LB: loop body
LE: loop exit
PB: predicated region body
PF: predicated region fallthrough
CT: control target
= control target key end

     0   :  { %11 = vsyncpa [#allocation3], 0  ;;  %s1646_s0 = inlined_call_operand.vmem [shape: bf16[128,32], index: 0, kind: input, shape index: {}]   ;;  %s1647_s1 = inlined_call_operand.hbm [shape: bf16[32,384], index: 1, kind: input, shape index: {}]   ;;  %s1648_s2 = inlined_call_operand.vmem [shape: bf16[128,128], index: 2, kind: input, shape index: {}]   ;;  %s1649_s3 = inlined_call_operand.vmem [shape: f32[1,128], index: 3, kind: input, shape index: {}]   ;;  %s1650_s4 = inlined_call_operand.hbm [shape: f32[128,128], index: 4, kind: output, shape index: {0}]   ;;  %s1651_s5 = inlined_call_operand.hbm [shape: f32[128,128], index: 5, kind: output, shape index: {1}]  }
   0x1   :  { %12 = vsyncpa [#allocation4], 0 }
   0x2   :  { %14 = vsyncpa [#allocation4 + $0x1], 0 }
   0x3   :  { %15 = vsyncpa [#allocation7], 0 }
   0x4   :  { %17 = vsyncpa [#allocation7 + $0x1], 0  ;;  %s1402_s18 = smov 0   ;;  %s1404_s19 = smov 0  }
   0x5   :  { %s1406_s20 = smov 0   ;;  %s1408_s21 = smov 0  }
   0x6 LB: > { %s1423_s22 = sadd.s32 4294967295, %s1365_s21   ;;  %s960_s23 = sadd.s32 4294967294, %s1365_s21   ;;  %s1365_s21 = sphi %s1408_s21, %s1657_s21   ;;  %s1361_s20 = sphi %s1406_s20, %s1656_s20   ;;  %s1357_s19 = sphi %s1404_s19, %s1655_s19   ;;  %s1353_s18 = sphi %s1402_s18, %s1654_s18  }
   0x7   : > { %s1427_s24 = sadd.s32 1, %s1365_s21   ;;  %s114_s25 = sadd.s32 1, %s1361_s20 }
   0x8   : > { %s111_s26 = ssub.s32 %s1365_s21, %s1427_s24  ;;  %p124_p0 = scmp.ne.s32.totalorder %s1361_s20, %s1357_s19 }
   0x9   : > { %p112_p1 = scmp.eq.s32.totalorder %s111_s26, 0  ;;  %p125_p2 = scmp.eq.s32.totalorder %s1423_s22, 1 }
   0xa   : > { %p130_p3 = scmp.ne.s32.totalorder %s1357_s19, %s1353_s18  ;;  %p131_p4 = scmp.eq.s32.totalorder %s960_s23, 1 }
   0xb   : > { %s1438_s27 = scalar_select %p112_p1, %s1361_s20, %s114_s25  }
   0xc   : > { %p1440_p5 = por %p125_p2, %p124_p0  ;;  %p1444_p6 = por %p131_p4, %p130_p3 }
   0xd   : > { %p961_p7 = scmp.ge.s32.totalorder %s1365_s21, 1  ;;  %p164_p8 = scmp.lt.s32.totalorder %s1365_s21, 3 }
   0xe   : > { %p1164_p9 = scmp.eq.s32.totalorder %s1423_s22, 0  ;;  %s178_s7 = sshll.u32 %s1647_s1, 4  ;;  %s179_s7 = int_to_ptr.hbm [resolvable:$true] %s178_s7 }
   0xf   : > { %p165_p10 = pnand %p961_p7, %p164_p8  ;;  %s1367_s8 = smov [#allocation2]  }
  0x10   : > { %s180_s9 = sshll.u32 %s1367_s8, 4  ;;  %s1368_s10 = smov 192   ;;  %s181_s9 = int_to_ptr.vmem [resolvable:$true] %s180_s9 }
  0x11   : > { %p1153_p11 = pneg %p165_p10  ;;  %s1369_s11 = smov 12  }
  0x12   : > { %202 = sbr.rel (%p165_p10) target bundleno = 1067 (0x42b), region = 36 }
  0x13   : > { %p1154_p12 = pnand %p1164_p9, %p1153_p11 }
  0x15   : > { %1156 = dma.hbm_to_vmem [thread:$0]  (!%p1154_p12), %s179_s7, 768, %s181_s9, [#allocation3], %s1368_s10, %s1368_s10, %s1369_s11  }
  0x17   : > { %1340 = dma.done.wait (%p1164_p9), [#allocation3], 768  }
  0x18   : > { %1342 = vsyncadd (%p1164_p9), [#allocation3], 4294966528  ;;  %v1039_v0 = vld [vmem:[#allocation2 + $0x1c] sm:$0xf]  ;;  %v1118_v1 = vld [vmem:[#allocation2 + $0x24] sm:$0xf0] }
  0x19   : > { %v1031_v2 = vld [vmem:[#allocation2 + $0x4] sm:$0xf]  ;;  %v1040_v3 = vor.u32 %v1118_v1, %v1039_v0  ;;  %v1116_v4 = vld [vmem:[#allocation2 + $0xc] sm:$0xf0]  ;;  %vm303_vm0 = vcmask 261120   ;;  %v1102_v7 = vld [vmem:[%s1646_s0 + $0x8] sm:$0xff] }
  0x1a   : > { %v1032_v5 = vor.u32 %v1116_v4, %v1031_v2  ;;  %v1101_v6 = vld [vmem:[%s1646_s0] sm:$0xff]  ;;  %v1103_v8 = vld [vmem:[%s1646_s0 + $0x10] sm:$0xff]  ;;  %v1104_v9 = vld [vmem:[%s1646_s0 + $0x18] sm:$0xff]  ;;  %s1498_s10 = sshll.u32 %s1423_s22, 6  ;;  %s1572_s22 = sand.u32 1, %s1357_s19  }
  0x1b   : > { %435 = vmatpush.bf16.msra.mxu1 %v1040_v3  ;;  %v1479_v10 = vld [vmem:[%s1646_s0 + $0x20] sm:$0xff]  ;;  %v1486_v11 = vld [vmem:[%s1646_s0 + $0x28] sm:$0xff]  ;;  %v1493_v12 = vld [vmem:[%s1646_s0 + $0x30] sm:$0xff]  ;;  %s251_s11 = sshra.s32 %s1498_s10, 3  ;;  %s965_s23 = sshll.u32 %s1572_s22, 6 }
  0x1c   : > { %v991_v13 = vld [vmem:[#allocation2 + $0x18] sm:$0xf]  ;;  %v1114_v14 = vld [vmem:[#allocation2 + $0x20] sm:$0xf0]  ;;  %v987_v16 = vld [vmem:[#allocation2] sm:$0xf]  ;;  %s859_s6 = scalar_lea.hbm %s1651_s5, %s1498_s10 }
  0x1d   : > { %v992_v15 = vor.u32 %v1114_v14, %v991_v13  ;;  %v1113_v17 = vld [vmem:[#allocation2 + $0x8] sm:$0xf0]  ;;  %s968_s12 = sshll.u32 %s251_s11, 2  ;;  %v1507_v19 = vld [vmem:[%s1646_s0 + $0x38] sm:$0xff]  ;;  %v1117_v36 = vld [vmem:[#allocation2 + $0x20] sm:$0xf] }
  0x1e   : > { %v988_v18 = vor.u32 %v1113_v17, %v987_v16  ;;  %s254_s15 = scalar_lea.vmem %s1646_s0, %s968_s12  ;;  %v1041_v37 = vld [vmem:[#allocation2 + $0x28] sm:$0xf0]  ;;  %v1115_v38 = vld [vmem:[#allocation2 + $0x8] sm:$0xf]  ;;  %v1033_v40 = vld [vmem:[#allocation2 + $0x10] sm:$0xf0] }
  0x1f   : > { %436 = vmatpush.bf16.msra.mxu1 %v1032_v5  ;;  %322 = vmatpush.bf16.msra.mxu0 %v992_v15  ;;  %v1109_v20 = vld [vmem:[%s254_s15] sm:$0xff]  ;;  %v1110_v22 = vld [vmem:[%s254_s15 + $0x8] sm:$0xff]  ;;  %v1111_v26 = vld [vmem:[%s254_s15 + $0x10] sm:$0xff]  ;;  %v1044_v39 = vor.u32 %v1117_v36, %v1041_v37  ;;  %v1036_v41 = vor.u32 %v1115_v38, %v1033_v40  ;;  %s1577_s25 = scalar_lea.vmem [#allocation6], %s965_s23  ;;  %s862_s7 = sshll.u32 %s859_s6, 4  ;;  %s863_s7 = int_to_ptr.hbm [resolvable:$true] %s862_s7 }
  0x20   : > { %v1112_v30 = vld [vmem:[%s254_s15 + $0x18] sm:$0xff]  ;;  %s860_s8 = sshll.u32 %s1577_s25, 4  ;;  %s831_s9 = scalar_lea.sflag [#allocation7], %s1572_s22  ;;  %s861_s8 = int_to_ptr.vmem [resolvable:$true] %s860_s8 }
  0x21   : > { %484 = vmatpush.bf16.msra.mxu2 %v1044_v39  ;;  %s1281_s11 = sshra.s32 %s863_s7, 4  ;;  %s1287_s15 = scalar_lea.hbm %s1651_s5, 128  ;;  %s1282_s11 = int_to_ptr.hbm [resolvable:$true] %s1281_s11 }
  0x22   : > { %1045 = vmatmul.msk.bf16.vlgmr.msra.gmra.mxu1 %vm303_vm0, %v1101_v6  ;;  %s1283_s12 = scalar_lea.hbm %s1282_s11, 64  ;;  %p1288_p2 = scmp.lt.s32.totalorder %s1282_s11, %s1651_s5 }
  0x23   : > { %323 = vmatpush.bf16.msra.mxu0 %v988_v18  ;;  %p1284_p13 = scmp.ne.s32.totalorder %s1282_s11, %s1283_s12  ;;  %p1289_p3 = scmp.lt.s32.totalorder %s1287_s15, %s1283_s12 }
  0x25   : > { %485 = vmatpush.bf16.msra.mxu2 %v1036_v41  ;;  %p1285_p0 = pnand %p1284_p13, %p1440_p5  ;;  %p1290_p4 = por %p1289_p3, %p1288_p2 }
  0x26   : > { %993 = vmatmul.msk.bf16.vlgmr.msra.gmra.mxu0 %vm303_vm0, %v1109_v20 }
  0x27   : > { %p1286_p1 = pneg %p1285_p0 }
  0x28   : > { %1053 = vmatmul.msk.bf16.vlgmr.msra.gmra.mxu2 %vm303_vm0, %v1101_v6 }
  0x29   : > { %p1291_p7 = pnand %p1290_p4, %p1286_p1 }
  0x32   : > { %1046 = vmatmul.msk.bf16.gmra.mxu1 %vm303_vm0, %v1102_v7 }
  0x36   : > { %994 = vmatmul.msk.bf16.gmra.mxu0 %vm303_vm0, %v1110_v22 }
  0x38   : > { %1054 = vmatmul.msk.bf16.gmra.mxu2 %vm303_vm0, %v1102_v7 }
  0x42   : > { %1047 = vmatmul.msk.bf16.gmra.mxu1 %vm303_vm0, %v1103_v8 }
  0x46   : > { %995 = vmatmul.msk.bf16.gmra.mxu0 %vm303_vm0, %v1111_v26 }
  0x48   : > { %1055 = vmatmul.msk.bf16.gmra.mxu2 %vm303_vm0, %v1103_v8 }
  0x52   : > { %1048 = vmatmul.msk.bf16.gmra.mxu1 %vm303_vm0, %v1104_v9 }
  0x56   : > { %996 = vmatmul.msk.bf16.gmra.mxu0 %vm303_vm0, %v1112_v30 }
  0x58   : > { %1056 = vmatmul.msk.bf16.gmra.mxu2 %vm303_vm0, %v1104_v9 }
  0x62   : > { %1049 = vmatmul.msk.bf16.gmra.mxu1 %vm303_vm0, %v1479_v10 }
  0x68   : > { %1057 = vmatmul.msk.bf16.gmra.mxu2 %vm303_vm0, %v1479_v10 }
  0x72   : > { %1050 = vmatmul.msk.bf16.gmra.mxu1 %vm303_vm0, %v1486_v11 }
  0x78   : > { %1058 = vmatmul.msk.bf16.gmra.mxu2 %vm303_vm0, %v1486_v11 }
  0x82   : > { %1051 = vmatmul.msk.bf16.gmra.mxu1 %vm303_vm0, %v1493_v12 }
  0x88   : > { %1059 = vmatmul.msk.bf16.gmra.mxu2 %vm303_vm0, %v1493_v12 }
  0x92   : > { %1052 = vmatmul.msk.bf16.gmra.mxu1 %vm303_vm0, %v1507_v19 }
  0x98   : > { %1060 = vmatmul.msk.bf16.gmra.mxu2 %vm303_vm0, %v1507_v19  ;;  %v576_v19 = vlaneseq }
  0x9f   : > { %v438_v21 = vpop.f32.mrf.mxu1 }
  0xa3   : > { %v325_v52 = vpop.f32.mrf.mxu0 }
  0xa7   : > { %v440_v23 = vpop.f32.mrf.mxu1 }
  0xa8   : > { %v531_v24 = vpack.c.bf16 %v440_v23, %v438_v21  ;;  %v577_v21 = vand.u32 127, %v576_v19 }
  0xaa   : > { %vm578_vm1 = vcmp.lt.s32.totalorder %v577_v21, 100 }
  0xab   : > { %v327_v54 = vpop.f32.mrf.mxu0  ;;  %v487_v1 = vpop.f32.mrf.mxu2 }
  0xac   : > { %v527_v61 = vpack.c.bf16 %v327_v54, %v325_v52 }
  0xaf   : > { %v443_v25 = vpop.f32.mrf.mxu1 }
  0xb3   : > { %v330_v56 = vpop.f32.mrf.mxu0  ;;  %v489_v3 = vpop.f32.mrf.mxu2 }
  0xb4   : > { %v1527_v4 = vpack.c.bf16 %v489_v3, %v487_v1 }
  0xb7   : > { %v445_v27 = vpop.f32.mrf.mxu1 }
  0xb8   : > { %v532_v28 = vpack.c.bf16 %v445_v27, %v443_v25 }
  0xbb   : > { %v332_v57 = vpop.f32.mrf.mxu0  ;;  %v492_v5 = vpop.f32.mrf.mxu2 }
  0xbc   : > { %v528_v2 = vpack.c.bf16 %v332_v57, %v330_v56 }
  0xbf   : > { %v448_v29 = vpop.f32.mrf.mxu1 }
  0xc3   : > { %v335_v58 = vpop.f32.mrf.mxu0  ;;  %v494_v6 = vpop.f32.mrf.mxu2 }
  0xc4   : > { %v1529_v7 = vpack.c.bf16 %v494_v6, %v492_v5 }
  0xc7   : > { %v450_v31 = vpop.f32.mrf.mxu1 }
  0xc8   : > { %v533_v32 = vpack.c.bf16 %v450_v31, %v448_v29 }
  0xcb   : > { %v337_v59 = vpop.f32.mrf.mxu0  ;;  %v497_v8 = vpop.f32.mrf.mxu2 }
  0xcc   : > { %v529_v60 = vpack.c.bf16 %v337_v59, %v335_v58 }
  0xcf   : > { %v453_v33 = vpop.f32.mrf.mxu1 }
  0xd3   : > { %v340_v62 = vpop.f32.mrf.mxu0  ;;  %v499_v9 = vpop.f32.mrf.mxu2 }
  0xd4   : > { %v665_v10 = vpack.c.bf16 %v499_v9, %v497_v8 }
  0xd7   : > { %v455_v34 = vpop.f32.mrf.mxu1 }
  0xd8   : > { %v534_v35 = vpack.c.bf16 %v455_v34, %v453_v33 }
  0xdb   : > { %v342_v63 = vpop.f32.mrf.mxu0  ;;  %v502_v11 = vpop.f32.mrf.mxu2 }
  0xdc   : > { %v530_v0 = vpack.c.bf16 %v342_v63, %v340_v62 }
  0xdf   : > { %v458_v42 = vpop.f32.mrf.mxu1 }
  0xe3   : > { %v504_v12 = vpop.f32.mrf.mxu2 }
  0xe4   : > { %v666_v13 = vpack.c.bf16 %v504_v12, %v502_v11 }
  0xe7   : > { %v460_v43 = vpop.f32.mrf.mxu1 }
  0xe8   : > { %v535_v44 = vpack.c.bf16 %v460_v43, %v458_v42 }
  0xeb   : > { %v507_v14 = vpop.f32.mrf.mxu2 }
  0xef   : > { %v463_v45 = vpop.f32.mrf.mxu1 }
  0xf3   : > { %v509_v15 = vpop.f32.mrf.mxu2 }
  0xf4   : > { %v667_v41 = vpack.c.bf16 %v509_v15, %v507_v14 }
  0xf7   : > { %v465_v46 = vpop.f32.mrf.mxu1 }
  0xf8   : > { %v536_v55 = vpack.c.bf16 %v465_v46, %v463_v45 }
  0xfb   : > { %v512_v16 = vpop.f32.mrf.mxu2 }
  0xff   : > { %v468_v47 = vpop.f32.mrf.mxu1 }
 0x103   : > { %v514_v17 = vpop.f32.mrf.mxu2 }
 0x104   : > { %v668_v36 = vpack.c.bf16 %v514_v17, %v512_v16 }
 0x107   : > { %v470_v48 = vpop.f32.mrf.mxu1 }
 0x108   : > { %v537_v53 = vpack.c.bf16 %v470_v48, %v468_v47 }
 0x10b   : > { %v517_v18 = vpop.f32.mrf.mxu2 }
 0x10f   : > { %v473_v49 = vpop.f32.mrf.mxu1 }
 0x113   : > { %v519_v20 = vpop.f32.mrf.mxu2 }
 0x114   : > { %v669_v34 = vpack.c.bf16 %v519_v20, %v517_v18 }
 0x117   : > { %v475_v50 = vpop.f32.mrf.mxu1 }
 0x118   : > { %v538_v51 = vpack.c.bf16 %v475_v50, %v473_v49 }
 0x11a   : > { %539 = vmatpush.bf16.xpose.msrb.mxu0 %v538_v51  ;;  %1129 = vmatpush.bf16.xpose.msra.mxu3 %v538_v51 }
 0x11b   : > { %v522_v23 = vpop.f32.mrf.mxu2 }
 0x122   : > { %540 = vmatpush.bf16.xpose.msrb.mxu0 %v537_v53  ;;  %1130 = vmatpush.bf16.xpose.msra.mxu3 %v537_v53 }
 0x123   : > { %v524_v29 = vpop.f32.mrf.mxu2 }
 0x12a   : > { %541 = vmatpush.bf16.xpose.msrb.mxu0 %v536_v55  ;;  %1131 = vmatpush.bf16.xpose.msra.mxu3 %v536_v55 }
 0x132   : > { %542 = vmatpush.bf16.xpose.msrb.mxu0 %v535_v44  ;;  %1132 = vmatpush.bf16.xpose.msra.mxu3 %v535_v44 }
 0x13a   : > { %543 = vmatpush.bf16.xpose.msrb.mxu0 %v534_v35  ;;  %1133 = vmatpush.bf16.xpose.msra.mxu3 %v534_v35 }
 0x142   : > { %544 = vmatpush.bf16.xpose.msrb.mxu0 %v533_v32  ;;  %1134 = vmatpush.bf16.xpose.msra.mxu3 %v533_v32  ;;  %v670_v32 = vpack.c.bf16 %v524_v29, %v522_v23  ;;  %v1125_v29 = vld [vmem:[%s1648_s2 + $0x30] sm:$0xff] }
 0x144   : > { %1137 = vmatpush.bf16.msrb.mxu1 %v670_v32 }
 0x148   : > { %1138 = vmatpush.bf16.msrb.mxu1 %v669_v34 }
 0x14a   : > { %545 = vmatpush.bf16.xpose.msrb.mxu0 %v532_v28  ;;  %1135 = vmatpush.bf16.xpose.msra.mxu3 %v532_v28 }
 0x14c   : > { %1139 = vmatpush.bf16.msrb.mxu1 %v668_v36 }
 0x150   : > { %1140 = vmatpush.bf16.msrb.mxu1 %v667_v41 }
 0x152   : > { %546 = vmatpush.bf16.xpose.msrb.mxu0 %v531_v24  ;;  %1136 = vmatpush.bf16.xpose.msra.mxu3 %v531_v24 }
 0x154   : > { %1141 = vmatpush.bf16.msrb.mxu1 %v666_v13 }
 0x158   : > { %1142 = vmatpush.bf16.msrb.mxu1 %v665_v10 }
 0x159   : > { %547 = vmatmul.bf16.vlgmr.msrb.gmra.mxu0 %v527_v61  ;;  %557 = vmatmul.bf16.vlgmr.msra.gmra.mxu3 %v529_v60 }
 0x15a   : > { %671 = vmatpush.bf16.msra.mxu0 %v670_v32  ;;  %v1124_v32 = vld [vmem:[%s1648_s2 + $0x28] sm:$0xff] }
 0x15c   : > { %1143 = vmatpush.bf16.msrb.mxu1 %v1529_v7 }
 0x15e   : > { %672 = vmatpush.bf16.msra.mxu0 %v669_v34  ;;  %v1123_v34 = vld [vmem:[%s1648_s2 + $0x20] sm:$0xff] }
 0x160   : > { %1144 = vmatpush.bf16.msrb.mxu1 %v1527_v4 }
 0x162   : > { %673 = vmatpush.bf16.msra.mxu0 %v668_v36 }
 0x166   : > { %674 = vmatpush.bf16.msra.mxu0 %v667_v41 }
 0x169   : > { %552 = vmatmul.bf16.gmra.mxu0 %v528_v2  ;;  %562 = vmatmul.bf16.gmra.mxu3 %v530_v0 }
 0x16a   : > { %675 = vmatpush.bf16.msra.mxu0 %v666_v13 }
 0x16e   : > { %676 = vmatpush.bf16.msra.mxu0 %v665_v10 }
 0x172   : > { %677 = vmatpush.bf16.msra.mxu0 %v1529_v7 }
 0x176   : > { %678 = vmatpush.bf16.msra.mxu0 %v1527_v4 }
 0x1d6   : > { %v548_v22 = vpop.f32.mrf.mxu0 }
 0x1d7   : > { %v568_v24 = vmul.f32 0.17677669, %v548_v22 }
 0x1d9   : > { %v579_v25 = vsel %vm578_vm1, %v568_v24, -1e+30 }
 0x1da   : > { %587 = vmax.xlane.f32.xlu0 %v579_v25 }
 0x1dc   : > { %v558_v26 = vpop.f32.mrf.mxu3 }
 0x1dd   : > { %v572_v27 = vmul.f32 0.17677669, %v558_v26 }
 0x1de   : > { %v550_v28 = vpop.f32.mrf.mxu0 }
 0x1df   : > { %v569_v30 = vmul.f32 0.17677669, %v550_v28  ;;  %v583_v31 = vsel %vm578_vm1, %v572_v27, -1e+30  ;;  %v1126_v28 = vld [vmem:[%s1648_s2 + $0x38] sm:$0xff] }
 0x1e0   : > { %595 = vmax.xlane.f32.xlu2 %v583_v31  ;;  %780 = vmatpush.bf16.msrb.mxu3 %v1126_v28 }
 0x1e1   : > { %v580_v33 = vsel %vm578_vm1, %v569_v30, -1e+30 }
 0x1e2   : > { %589 = vmax.xlane.f32.xlu0 %v580_v33 }
 0x1e4   : > { %v560_v35 = vpop.f32.mrf.mxu3  ;;  %781 = vmatpush.bf16.msrb.mxu3 %v1125_v29 }
 0x1e5   : > { %v573_v37 = vmul.f32 0.17677669, %v560_v35 }
 0x1e6   : > { %v553_v38 = vpop.f32.mrf.mxu0 }
 0x1e7   : > { %v570_v39 = vmul.f32 0.17677669, %v553_v38  ;;  %v584_v40 = vsel %vm578_vm1, %v573_v37, -1e+30 }
 0x1e8   : > { %597 = vmax.xlane.f32.xlu2 %v584_v40  ;;  %782 = vmatpush.bf16.msrb.mxu3 %v1124_v32 }
 0x1e9   : > { %v581_v42 = vsel %vm578_vm1, %v570_v39, -1e+30 }
 0x1ea   : > { %591 = vmax.xlane.f32.xlu1 %v581_v42 }
 0x1ec   : > { %v563_v43 = vpop.f32.mrf.mxu3  ;;  %783 = vmatpush.bf16.msrb.mxu3 %v1123_v34 }
 0x1ed   : > { %v574_v44 = vmul.f32 0.17677669, %v563_v43 }
 0x1ee   : > { %v555_v45 = vpop.f32.mrf.mxu0 }
 0x1ef   : > { %v571_v46 = vmul.f32 0.17677669, %v555_v45  ;;  %v585_v47 = vsel %vm578_vm1, %v574_v44, -1e+30 }
 0x1f0   : > { %599 = vmax.xlane.f32.xlu0 %v585_v47 }
 0x1f1   : > { %v582_v48 = vsel %vm578_vm1, %v571_v46, -1e+30 }
 0x1f2   : > { %593 = vmax.xlane.f32.xlu1 %v582_v48 }
 0x1f4   : > { %v565_v49 = vpop.f32.mrf.mxu3 }
 0x1f5   : > { %v575_v50 = vmul.f32 0.17677669, %v565_v49 }
 0x1f7   : > { %v586_v51 = vsel %vm578_vm1, %v575_v50, -1e+30 }
 0x1fa   : > { %601 = vmax.xlane.f32.xlu1 %v586_v51 }
 0x24d   : > { %v588_v52 = vpop.xlane.xlu0 %587 }
 0x24e   : > { %v603_v53 = vsub.f32 %v579_v25, %v588_v52 }
 0x250   : > { %v611_v54 = vmul.f32 1.442695, %v603_v53  ;;  %v1121_v53 = vld [vmem:[%s1648_s2 + $0x10] sm:$0xff] }
 0x252   : > { %1205 = vpow2.f32 %v611_v54  ;;  %v1120_v54 = vld [vmem:[%s1648_s2 + $0x8] sm:$0xff] }
 0x253   : > { %v596_v55 = vpop.xlane.xlu2 %595 }
 0x254   : > { %v607_v60 = vsub.f32 %v583_v31, %v596_v55  ;;  %v1119_v55 = vld [vmem:[%s1648_s2] sm:$0xff] }
 0x255   : > { %v590_v56 = vpop.xlane.xlu0 %589 }
 0x256   : > { %v604_v57 = vsub.f32 %v580_v33, %v590_v56  ;;  %v619_v61 = vmul.f32 1.442695, %v607_v60 }
 0x258   : > { %v1206_v58 = vpop.eup %1205  ;;  %v613_v59 = vmul.f32 1.442695, %v604_v57 }
 0x259   : > { %627 = vadd.xlane.f32.xlu2 %v1206_v58 }
 0x25a   : > { %1207 = vpow2.f32 %v613_v59 }
 0x25b   : > { %v598_v63 = vpop.xlane.xlu2 %597  ;;  %1209 = vpow2.f32 %v619_v61 }
 0x25c   : > { %v608_v3 = vsub.f32 %v584_v40, %v598_v63 }
 0x25d   : > { %v592_v62 = vpop.xlane.xlu1 %591 }
 0x25e   : > { %v605_v0 = vsub.f32 %v581_v42, %v592_v62  ;;  %v621_v4 = vmul.f32 1.442695, %v608_v3  ;;  %v1122_v42 = vld [vmem:[%s1648_s2 + $0x18] sm:$0xff] }
 0x25f   : > { %784 = vmatpush.bf16.msrb.mxu3 %v1122_v42 }
 0x260   : > { %v1208_v1 = vpop.eup %1207  ;;  %v615_v2 = vmul.f32 1.442695, %v605_v0 }
 0x261   : > { %629 = vadd.xlane.f32.xlu0 %v1208_v1  ;;  %v1543_v8 = vpop.eup %1209 }
 0x262   : > { %1211 = vpow2.f32 %v615_v2 }
 0x263   : > { %v600_v6 = vpop.xlane.xlu0 %599  ;;  %1213 = vpow2.f32 %v621_v4  ;;  %785 = vmatpush.bf16.msrb.mxu3 %v1121_v53 }
 0x264   : > { %v609_v11 = vsub.f32 %v585_v47, %v600_v6 }
 0x265   : > { %v594_v5 = vpop.xlane.xlu1 %593 }
 0x266   : > { %v606_v7 = vsub.f32 %v582_v48, %v594_v5  ;;  %v623_v12 = vmul.f32 1.442695, %v609_v11 }
 0x267   : > { %786 = vmatpush.bf16.msrb.mxu3 %v1120_v54 }
 0x268   : > { %v1212_v9 = vpop.eup %1211  ;;  %v617_v10 = vmul.f32 1.442695, %v606_v7 }
 0x269   : > { %635 = vadd.xlane.f32.xlu0 %v1543_v8  ;;  %631 = vadd.xlane.f32.xlu1 %v1212_v9  ;;  %v1214_v15 = vpop.eup %1213 }
 0x26a   : > { %1215 = vpow2.f32 %v617_v10 }
 0x26b   : > { %1217 = vpow2.f32 %v623_v12  ;;  %787 = vmatpush.bf16.msrb.mxu3 %v1119_v55 }
 0x26d   : > { %v602_v13 = vpop.xlane.xlu1 %601 }
 0x26e   : > { %v610_v14 = vsub.f32 %v586_v51, %v602_v13 }
 0x270   : > { %v1216_v16 = vpop.eup %1215  ;;  %v625_v17 = vmul.f32 1.442695, %v610_v14 }
 0x271   : > { %637 = vadd.xlane.f32.xlu1 %v1214_v15  ;;  %633 = vadd.xlane.f32.xlu2 %v1216_v16  ;;  %v1218_v18 = vpop.eup %1217 }
 0x272   : > { %1219 = vpow2.f32 %v625_v17 }
 0x278   : > { %v1220_v19 = vpop.eup %1219 }
 0x279   : > { %639 = vadd.xlane.f32.xlu2 %v1218_v18  ;;  %641 = vadd.xlane.f32.xlu0 %v1220_v19 }
 0x2cc   : > { %v628_v20 = vpop.xlane.xlu2 %627 }
 0x2cd   : > { %1221 = vrcp.f32 %v628_v20 }
 0x2d3   : > { %v1222_v22 = vpop.eup %1221 }
 0x2d4   : > { %v630_v21 = vpop.xlane.xlu0 %629  ;;  %v651_v24 = vmul.f32 %v1222_v22, %v1206_v58 }
 0x2d5   : > { %1223 = vrcp.f32 %v630_v21 }
 0x2db   : > { %v1224_v23 = vpop.eup %1223 }
 0x2dc   : > { %v652_v25 = vmul.f32 %v1224_v23, %v1208_v1  ;;  %v632_v27 = vpop.xlane.xlu1 %631  ;;  %v636_v30 = vpop.xlane.xlu0 %635 }
 0x2dd   : > { %1225 = vrcp.f32 %v632_v27 }
 0x2de   : > { %v659_v26 = vpack.c.bf16 %v652_v25, %v651_v24 }
 0x2e0   : > { %679 = vmatmul.bf16.vlgmr.msra.gmra.mxu0 %v659_v26 }
 0x2e3   : > { %v1226_v33 = vpop.eup %1225 }
 0x2e4   : > { %v634_v31 = vpop.xlane.xlu2 %633  ;;  %v653_v38 = vmul.f32 %v1226_v33, %v1212_v9  ;;  %v638_v40 = vpop.xlane.xlu1 %637 }
 0x2e5   : > { %1227 = vrcp.f32 %v634_v31 }
 0x2eb   : > { %v1228_v35 = vpop.eup %1227 }
 0x2ec   : > { %v640_v36 = vpop.xlane.xlu2 %639  ;;  %v642_v37 = vpop.xlane.xlu0 %641  ;;  %v654_v39 = vmul.f32 %v1228_v35, %v1216_v16 }
 0x2ed   : > { %1229 = vrcp.f32 %v640_v36 }
 0x2ee   : > { %1231 = vrcp.f32 %v642_v37  ;;  %v660_v41 = vpack.c.bf16 %v654_v39, %v653_v38 }
 0x2ef   : > { %1233 = vrcp.f32 %v638_v40 }
 0x2f0   : > { %684 = vmatmul.bf16.gmra.mxu0 %v660_v41  ;;  %1235 = vrcp.f32 %v636_v30 }
 0x2f3   : > { %v1230_v43 = vpop.eup %1229 }
 0x2f4   : > { %v1232_v44 = vpop.eup %1231  ;;  %v657_v45 = vmul.f32 %v1230_v43, %v1218_v18 }
 0x2f5   : > { %v658_v46 = vmul.f32 %v1232_v44, %v1220_v19  ;;  %v1234_v47 = vpop.eup %1233 }
 0x2f6   : > { %v1236_v49 = vpop.eup %1235  ;;  %v656_v50 = vmul.f32 %v1234_v47, %v1214_v15 }
 0x2f7   : > { %v662_v48 = vpack.c.bf16 %v658_v46, %v657_v45  ;;  %v655_v51 = vmul.f32 %v1236_v49, %v1543_v8 }
 0x2f9   : > { %694 = vmatmul.bf16.vlgmr.msrb.gmra.mxu1 %v662_v48  ;;  %v661_v52 = vpack.c.bf16 %v656_v50, %v655_v51 }
 0x300   : > { %689 = vmatmul.bf16.gmra.mxu0 %v661_v52 }
 0x35d   : > { %v680_v56 = vpop.f32.mrf.mxu0 }
 0x35e   : > { %809 = vst [vmem:[%s1577_s25] sm:$0xff] %v680_v56  ;;  %v700_v58 = vmax.f32 %v680_v56, 0.0 }
 0x365   : > { %v682_v57 = vpop.f32.mrf.mxu0 }
 0x366   : > { %v701_v59 = vmax.f32 %v682_v57, 0.0  ;;  %810 = vst [vmem:[%s1577_s25 + $0x8] sm:$0xff] %v682_v57 }
 0x368   : > { %v708_v60 = vpack.c.bf16 %v701_v59, %v700_v58 }
 0x36a   : > { %788 = vmatmul.bf16.vlgmr.msrb.gmra.mxu3 %v708_v60 }
 0x36d   : > { %v685_v61 = vpop.f32.mrf.mxu0 }
 0x36e   : > { %811 = vst [vmem:[%s1577_s25 + $0x10] sm:$0xff] %v685_v61  ;;  %v702_v63 = vmax.f32 %v685_v61, 0.0 }
 0x375   : > { %v687_v62 = vpop.f32.mrf.mxu0 }
 0x376   : > { %v703_v0 = vmax.f32 %v687_v62, 0.0  ;;  %812 = vst [vmem:[%s1577_s25 + $0x18] sm:$0xff] %v687_v62  ;;  %v695_v1 = vpop.f32.mrf.mxu1 }
 0x377   : > { %815 = vst [vmem:[%s1577_s25 + $0x30] sm:$0xff] %v695_v1  ;;  %v706_v10 = vmax.f32 %v695_v1, 0.0 }
 0x378   : > { %v709_v2 = vpack.c.bf16 %v703_v0, %v702_v63 }
 0x37a   : > { %793 = vmatmul.bf16.gmra.mxu3 %v709_v2 }
 0x37d   : > { %v690_v3 = vpop.f32.mrf.mxu0 }
 0x37e   : > { %813 = vst [vmem:[%s1577_s25 + $0x20] sm:$0xff] %v690_v3  ;;  %v697_v4 = vpop.f32.mrf.mxu1  ;;  %v704_v6 = vmax.f32 %v690_v3, 0.0 }
 0x37f   : > { %816 = vst [vmem:[%s1577_s25 + $0x38] sm:$0xff] %v697_v4  ;;  %v707_v9 = vmax.f32 %v697_v4, 0.0 }
 0x381   : > { %v711_v11 = vpack.c.bf16 %v707_v9, %v706_v10 }
 0x385   : > { %v692_v5 = vpop.f32.mrf.mxu0 }
 0x386   : > { %v705_v7 = vmax.f32 %v692_v5, 0.0  ;;  %814 = vst [vmem:[%s1577_s25 + $0x28] sm:$0xff] %v692_v5 }
 0x388   : > { %v710_v8 = vpack.c.bf16 %v705_v7, %v704_v6 }
 0x38a   : > { %798 = vmatmul.bf16.gmra.mxu3 %v710_v8 }
 0x39a   : > { %803 = vmatmul.bf16.gmra.mxu3 %v711_v11 }
 0x39b   : > { %1294 = shalt.err (!%p1291_p7)
}
 0x39c   : > { %s1370_s25 = smov 128   ;;  %s1371_s26 = smov 8   ;;  %v1204_v12 = vld [vmem:[%s1649_s3] ss:$0 sm:$0xff] }
 0x39d   : > { %1150 = dma.vmem_to_hbm [thread:$0]  (%p1440_p5), %s861_s8, 1024, %s863_s7, %s831_s9, %s1370_s25, %s1370_s25, %s1371_s26  }
 0x39e   : > { %s223_s11 = scalar_lea.vmem [#allocation5], %s965_s23  ;;  %s842_s8 = scalar_lea.hbm %s1650_s4, %s1498_s10 }
 0x39f   : > { %s845_s9 = sshll.u32 %s842_s8, 4  ;;  %s843_s12 = sshll.u32 %s223_s11, 4  ;;  %s846_s9 = int_to_ptr.hbm [resolvable:$true] %s845_s9  ;;  %s844_s12 = int_to_ptr.vmem [resolvable:$true] %s843_s12 }
 0x3a0   : > { %s826_s13 = scalar_lea.sflag [#allocation4], %s1572_s22  ;;  %s1309_s14 = sshra.s32 %s846_s9, 4  ;;  %s1310_s14 = int_to_ptr.hbm [resolvable:$true] %s1309_s14 }
 0x3a1   : > { %s1311_s15 = scalar_lea.hbm %s1310_s14, 64  ;;  %s1315_s10 = scalar_lea.hbm %s1650_s4, 128 }
 0x3a2   : > { %p1312_p8 = scmp.ne.s32.totalorder %s1310_s14, %s1311_s15  ;;  %p1316_p11 = scmp.lt.s32.totalorder %s1310_s14, %s1650_s4 }
 0x3a3   : > { %p1317_p12 = scmp.lt.s32.totalorder %s1315_s10, %s1311_s15 }
 0x3a4   : > { %p1313_p9 = pnand %p1312_p8, %p1440_p5 }
 0x3a5   : > { %p1318_p13 = por %p1317_p12, %p1316_p11 }
 0x3a6   : > { %p1314_p10 = pneg %p1313_p9 }
 0x3a8   : > { %p1319_p0 = pnand %p1318_p13, %p1314_p10 }
 0x3ed   : > { %v789_v13 = vpop.f32.mrf.mxu3 }
 0x3ee   : > { %v790_v14 = vadd.f32 %v1204_v12, %v789_v13 }
 0x3f0   : > { %817 = vst [vmem:[%s223_s11] sm:$0xff] %v790_v14 }
 0x3f5   : > { %v791_v15 = vpop.f32.mrf.mxu3 }
 0x3f6   : > { %v792_v16 = vadd.f32 %v1204_v12, %v791_v15 }
 0x3f8   : > { %818 = vst [vmem:[%s223_s11 + $0x8] sm:$0xff] %v792_v16 }
 0x3fd   : > { %v794_v17 = vpop.f32.mrf.mxu3 }
 0x3fe   : > { %v795_v18 = vadd.f32 %v1204_v12, %v794_v17 }
 0x400   : > { %819 = vst [vmem:[%s223_s11 + $0x10] sm:$0xff] %v795_v18 }
 0x405   : > { %v796_v19 = vpop.f32.mrf.mxu3 }
 0x406   : > { %v797_v20 = vadd.f32 %v1204_v12, %v796_v19 }
 0x408   : > { %820 = vst [vmem:[%s223_s11 + $0x18] sm:$0xff] %v797_v20 }
 0x40d   : > { %v799_v21 = vpop.f32.mrf.mxu3 }
 0x40e   : > { %v800_v22 = vadd.f32 %v1204_v12, %v799_v21 }
 0x410   : > { %821 = vst [vmem:[%s223_s11 + $0x20] sm:$0xff] %v800_v22 }
 0x415   : > { %v801_v23 = vpop.f32.mrf.mxu3 }
 0x416   : > { %v802_v24 = vadd.f32 %v1204_v12, %v801_v23 }
 0x418   : > { %822 = vst [vmem:[%s223_s11 + $0x28] sm:$0xff] %v802_v24 }
 0x41d   : > { %v804_v25 = vpop.f32.mrf.mxu3 }
 0x41e   : > { %v805_v26 = vadd.f32 %v1204_v12, %v804_v25 }
 0x420   : > { %823 = vst [vmem:[%s223_s11 + $0x30] sm:$0xff] %v805_v26 }
 0x425   : > { %v806_v27 = vpop.f32.mrf.mxu3 }
 0x426   : > { %v807_v28 = vadd.f32 %v1204_v12, %v806_v27 }
 0x428   : > { %824 = vst [vmem:[%s223_s11 + $0x38] sm:$0xff] %v807_v28 }
 0x429   : > { %1322 = shalt.err (!%p1319_p0)
}
 0x42a   : > { %1149 = dma.vmem_to_hbm [thread:$0]  (%p1440_p5), %s844_s12, 1024, %s846_s9, %s826_s13, %s1370_s25, %s1370_s25, %s1371_s26  }
 0x42b PF: > { %p1166_p1 = scmp.ge.s32.totalorder %s1365_s21, 2  ;;  %s877_s22 = sand.u32 1, %s1353_s18  }
 0x42c   : > { %s878_s11 = scalar_lea.sflag [#allocation4], %s877_s22 }
 0x42d   : > { %p1158_p2 = pnand %p1166_p1, %p1444_p6 }
 0x42f   : > { %p1159_p3 = pneg %p1158_p2 }
 0x431   : > { %1344 = dma.done.wait (%p1159_p3), %s878_s11, 1024  }
 0x432   : > { %1346 = vsyncadd (%p1159_p3), %s878_s11, 4294966272  ;;  %s888_s23 = scalar_lea.sflag [#allocation7], %s877_s22 }
 0x433   : > { %1348 = dma.done.wait (%p1159_p3), %s888_s23, 1024  }
 0x434   : > { %1350 = vsyncadd (%p1159_p3), %s888_s23, 4294966272  ;;  %p20_p5 = scmp.ge.s32.totalorder %s1427_s24, 4   ;;  %s1654_s18 = smov %s1357_s19 }
 0x435   : > { %s1655_s19 = smov %s1361_s20  ;;  %s1656_s20 = smov %s1438_s27 }
 0x436   : > { %s1657_s21 = smov %s1427_s24  ;;  %22 = sbr.rel (!%p20_p5) target bundleno = 6 (0x6), region = 91 }
 0x43b   :  { %894 = vsyncpa [#allocation3], 1 }
 0x43c   :  { %896 = vsyncpa [#allocation3 + $0x1], 1 }
 0x43d   :  { %897 = vsyncpa [#allocation4], 1 }
 0x43e   :  { %899 = vsyncpa [#allocation4 + $0x1], 1 }
 0x43f   :  { %900 = vsyncpa [#allocation7], 1 }
 0x440   :  { %902 = vsyncpa [#allocation7 + $0x1], 1 }

</bundles_post_ra>
